<compile_context>
chip_gen: v5e
topology: v5e:2x2
jax: 0.10.0
libtpu: 0.0.40
codegen_flags: <defaults>
</compile_context>

<pallas_src>
import functools

import jax
import jax.numpy as jnp
from jax.experimental import pallas as pl
from jax.experimental.pallas import tpu as pltpu

EPS = 1e-5
PAD = 128  # lane width; all feature dims are zero-padded to this


def _make_kernel(b_real: int, b_pad: int):
    """Build the fused FCNet kernel for a static (real, padded) batch size."""
    need_mask = b_pad != b_real
    inv_b = 1.0 / float(b_real)

    def fcnet_kernel(x_ref, w_ref, v_ref, out_ref):
        # x_ref:   (Bp, 128)      input, features zero-padded past col input_dim,
        #                         rows zero-padded past row b_real
        # w_ref:   (3, 128, 128)  [w1, w2, w3], each zero-padded (rows = in, cols = out)
        # v_ref:   (8, 128)       rows: b1, g1, be1, b2, g2, be2, b3, <zero pad>
        # out_ref: (2, Bp, 128)   row 0 = sigmoid(fc3) padded, row 1 = hidden (bn2+relu) padded
        x = x_ref[...]
        vecs = v_ref[...]                       # single (8,128) load; slice in-register
        b1, g1, be1 = vecs[0:1, :], vecs[1:2, :], vecs[2:3, :]
        b2, g2, be2 = vecs[3:4, :], vecs[4:5, :], vecs[5:6, :]
        b3 = vecs[6:7, :]

        if need_mask:
            rows = jax.lax.broadcasted_iota(jnp.int32, (b_pad, 1), 0)
            row_mask = (rows < b_real).astype(jnp.float32)   # (Bp, 1)

        def batch_stats(h):
            # mean / biased variance over the *real* batch rows only.
            if need_mask:
                hm = h * row_mask
                m = jnp.sum(hm, axis=0, keepdims=True) * inv_b
                d = (h - m) * row_mask
                v = jnp.sum(d * d, axis=0, keepdims=True) * inv_b
            else:
                m = jnp.sum(h, axis=0, keepdims=True) * inv_b
                d = h - m
                v = jnp.sum(d * d, axis=0, keepdims=True) * inv_b
            return m, v

        # --- fc1 + bn1 (batch stats, fused scale/shift) + relu ---
        h1 = jnp.dot(x, w_ref[0], preferred_element_type=jnp.float32) + b1
        m1, v1 = batch_stats(h1)
        s1 = g1 * jax.lax.rsqrt(v1 + EPS)       # (1, 128) scale
        t1 = be1 - m1 * s1                      # (1, 128) shift
        h1 = jnp.maximum(h1 * s1 + t1, 0.0)

        # --- fc2 + bn2 (batch stats, fused scale/shift) + relu ---
        h2 = jnp.dot(h1, w_ref[1], preferred_element_type=jnp.float32) + b2
        m2, v2 = batch_stats(h2)
        s2 = g2 * jax.lax.rsqrt(v2 + EPS)
        t2 = be2 - m2 * s2
        h2 = jnp.maximum(h2 * s2 + t2, 0.0)

        # --- fc3 + sigmoid ---
        o = jnp.dot(h2, w_ref[2], preferred_element_type=jnp.float32) + b3

        out_ref[0] = jax.nn.sigmoid(o)          # "output2" (cols 0..op_dim-1 valid)
        out_ref[1] = h2                         # "output"  (cols 0..hidden_2-1 valid)

    return fcnet_kernel


@functools.partial(jax.jit, static_argnames=("hidden_2", "op_dim"))
def fcnet_forward(x, w_packed, v_packed, *, hidden_2=50, op_dim=17):
    B, in_dim = x.shape
    b_pad = ((B + 7) // 8) * 8                  # sublane-align the batch
    xp = jnp.zeros((b_pad, PAD), jnp.float32).at[:B, :in_dim].set(x)

    out = pl.pallas_call(
        _make_kernel(B, b_pad),
        out_shape=jax.ShapeDtypeStruct((2, b_pad, PAD), jnp.float32),
        in_specs=[
            pl.BlockSpec(memory_space=pltpu.MemorySpace.VMEM),   # x (padded)
            pl.BlockSpec(memory_space=pltpu.MemorySpace.VMEM),   # packed weights (3,128,128)
            pl.BlockSpec(memory_space=pltpu.MemorySpace.VMEM),   # packed vectors (8,128)
        ],
        out_specs=pl.BlockSpec(memory_space=pltpu.MemorySpace.VMEM),
        compiler_params=pltpu.CompilerParams(vmem_limit_bytes=4 * 1024 * 1024),
    )(xp, w_packed, v_packed)

    out2 = out[0, :B, :op_dim]       # sigmoid(fc3(...))
    hidden = out[1, :B, :hidden_2]   # relu(bn2(fc2(...)))
    return out2, hidden


def make_params(key, input_dim=21, hidden_1=100, hidden_2=50, op_dim=17):
    """Deterministic synthetic params (PyTorch-like uniform(+-1/sqrt(fan_in)))."""
    ks = jax.random.split(key, 6)

    def lin(kw, kb, fan_in, fan_out):
        bound = 1.0 / jnp.sqrt(float(fan_in))
        w = jax.random.uniform(kw, (fan_in, fan_out), jnp.float32, -bound, bound)
        b = jax.random.uniform(kb, (1, fan_out), jnp.float32, -bound, bound)
        return w, b

    w1, b1 = lin(ks[0], ks[1], input_dim, hidden_1)
    w2, b2 = lin(ks[2], ks[3], hidden_1, hidden_2)
    w3, b3 = lin(ks[4], ks[5], hidden_2, op_dim)
    return dict(
        w1=w1, b1=b1, g1=jnp.ones((1, hidden_1), jnp.float32), be1=jnp.zeros((1, hidden_1), jnp.float32),
        w2=w2, b2=b2, g2=jnp.ones((1, hidden_2), jnp.float32), be2=jnp.zeros((1, hidden_2), jnp.float32),
        w3=w3, b3=b3,
    )


def pack_params(p):
    """Pack the 11 small params into one (3,128,128) weight slab and one (8,128) vector slab."""
    def pad_w(w):
        kin, kout = w.shape
        return jnp.zeros((PAD, PAD), jnp.float32).at[:kin, :kout].set(w)

    def pad_row(v):
        v = v.reshape(-1)
        return jnp.zeros((PAD,), jnp.float32).at[: v.shape[0]].set(v)

    w_packed = jnp.stack([pad_w(p["w1"]), pad_w(p["w2"]), pad_w(p["w3"])])       # (3,128,128)
    v_packed = jnp.stack([
        pad_row(p["b1"]), pad_row(p["g1"]), pad_row(p["be1"]),
        pad_row(p["b2"]), pad_row(p["g2"]), pad_row(p["be2"]),
        pad_row(p["b3"]), jnp.zeros((PAD,), jnp.float32),
    ])                                                                            # (8,128)
    return w_packed, v_packed


def fcnet_reference(x, p):
    """Plain-JAX reference (un-padded, un-fused) for correctness check."""
    h1 = x @ p["w1"] + p["b1"]
    m1 = h1.mean(0, keepdims=True)
    v1 = ((h1 - m1) ** 2).mean(0, keepdims=True)
    h1 = jnp.maximum((h1 - m1) / jnp.sqrt(v1 + EPS) * p["g1"] + p["be1"], 0.0)
    h2 = h1 @ p["w2"] + p["b2"]
    m2 = h2.mean(0, keepdims=True)
    v2 = ((h2 - m2) ** 2).mean(0, keepdims=True)
    h2 = jnp.maximum((h2 - m2) / jnp.sqrt(v2 + EPS) * p["g2"] + p["be2"], 0.0)
    o = h2 @ p["w3"] + p["b3"]
    return jax.nn.sigmoid(o), h2


if __name__ == "__main__":
    key = jax.random.PRNGKey(0)
    kx, kp = jax.random.split(key)

    B, input_dim, hidden_1, hidden_2, op_dim = 8, 21, 100, 50, 17
    x = jax.random.normal(kx, (B, input_dim), jnp.float32)
    params = make_params(kp, input_dim=input_dim, hidden_1=hidden_1,
                         hidden_2=hidden_2, op_dim=op_dim)
    w_packed, v_packed = pack_params(params)

    out2, hidden = jax.block_until_ready(
        fcnet_forward(x, w_packed, v_packed, hidden_2=hidden_2, op_dim=op_dim))

    ref2, refh = fcnet_reference(x, params)
    assert out2.shape == (B, op_dim) and hidden.shape == (B, hidden_2)
    assert jnp.allclose(out2, ref2, atol=1e-5), "sigmoid output mismatch"
    assert jnp.allclose(hidden, refh, atol=1e-4), "hidden output mismatch"

    # Also exercise a non-multiple-of-8 batch to check the BN row-masking path.
    B2 = 5
    x2 = jax.random.normal(jax.random.PRNGKey(7), (B2, input_dim), jnp.float32)
    o2, h2 = jax.block_until_ready(
        fcnet_forward(x2, w_packed, v_packed, hidden_2=hidden_2, op_dim=op_dim))
    r2, rh2 = fcnet_reference(x2, params)
    assert jnp.allclose(o2, r2, atol=1e-5), "sigmoid output mismatch (masked batch)"
    assert jnp.allclose(h2, rh2, atol=1e-4), "hidden output mismatch (masked batch)"

    print("KERNEL_OK")
</pallas_src>

<mosaic_0001>
module attributes {stable_mosaic.version = 11 : i64} {
  func.func @fcnet_kernel(%arg0: memref<8x128xf32, #tpu.memory_space<vmem>>, %arg1: memref<3x128x128xf32, #tpu.memory_space<vmem>>, %arg2: memref<8x128xf32, #tpu.memory_space<vmem>>, %arg3: memref<2x8x128xf32, #tpu.memory_space<vmem>>) attributes {dimension_semantics = [], scalar_prefetch = 0 : i64, scratch_operands = 0 : i64, tpu.core_type = #tpu.core_type<tc>} {
    %c0 = arith.constant 0 : index
    %c0_0 = arith.constant 0 : index
    %0 = vector.load %arg0[%c0, %c0_0] : memref<8x128xf32, #tpu.memory_space<vmem>>, vector<8x128xf32>
    %c0_1 = arith.constant 0 : index
    %c0_2 = arith.constant 0 : index
    %1 = vector.load %arg2[%c0_1, %c0_2] : memref<8x128xf32, #tpu.memory_space<vmem>>, vector<8x128xf32>
    %2 = vector.extract_strided_slice %1 {offsets = [0, 0], sizes = [1, 128], strides = [1, 1]} : vector<8x128xf32> to vector<1x128xf32>
    %3 = vector.extract_strided_slice %1 {offsets = [1, 0], sizes = [1, 128], strides = [1, 1]} : vector<8x128xf32> to vector<1x128xf32>
    %4 = vector.extract_strided_slice %1 {offsets = [2, 0], sizes = [1, 128], strides = [1, 1]} : vector<8x128xf32> to vector<1x128xf32>
    %5 = vector.extract_strided_slice %1 {offsets = [3, 0], sizes = [1, 128], strides = [1, 1]} : vector<8x128xf32> to vector<1x128xf32>
    %6 = vector.extract_strided_slice %1 {offsets = [4, 0], sizes = [1, 128], strides = [1, 1]} : vector<8x128xf32> to vector<1x128xf32>
    %7 = vector.extract_strided_slice %1 {offsets = [5, 0], sizes = [1, 128], strides = [1, 1]} : vector<8x128xf32> to vector<1x128xf32>
    %8 = vector.extract_strided_slice %1 {offsets = [6, 0], sizes = [1, 128], strides = [1, 1]} : vector<8x128xf32> to vector<1x128xf32>
    %c0_3 = arith.constant 0 : index
    %c0_4 = arith.constant 0 : index
    %c0_5 = arith.constant 0 : index
    %9 = vector.load %arg1[%c0_3, %c0_4, %c0_5] : memref<3x128x128xf32, #tpu.memory_space<vmem>>, vector<1x128x128xf32>
    %10 = vector.shape_cast %9 : vector<1x128x128xf32> to vector<128x128xf32>
    %cst = arith.constant dense<0.000000e+00> : vector<8x128xf32>
    %11 = tpu.matmul %0, %10, %cst {dimension_numbers = #tpu.dot_dimension_numbers<[1], [0], [0], [1], [0, 0, 1, 1], [], []>} : vector<8x128xf32>, vector<128x128xf32>, vector<8x128xf32> -> vector<8x128xf32>
    %12 = vector.broadcast %2 : vector<1x128xf32> to vector<8x128xf32>
    %13 = arith.addf %11, %12 : vector<8x128xf32>
    %cst_6 = arith.constant dense<0.000000e+00> : vector<128xf32>
    %14 = vector.multi_reduction <add>, %13, %cst_6 [0] : vector<8x128xf32> to vector<128xf32>
    %15 = vector.shape_cast %14 : vector<128xf32> to vector<1x128xf32>
    %cst_7 = arith.constant 1.250000e-01 : f32
    %16 = vector.broadcast %cst_7 : f32 to vector<1x128xf32>
    %17 = arith.mulf %15, %16 : vector<1x128xf32>
    %18 = vector.broadcast %17 : vector<1x128xf32> to vector<8x128xf32>
    %19 = arith.subf %13, %18 : vector<8x128xf32>
    %20 = arith.mulf %19, %19 : vector<8x128xf32>
    %cst_8 = arith.constant dense<0.000000e+00> : vector<128xf32>
    %21 = vector.multi_reduction <add>, %20, %cst_8 [0] : vector<8x128xf32> to vector<128xf32>
    %22 = vector.shape_cast %21 : vector<128xf32> to vector<1x128xf32>
    %cst_9 = arith.constant 1.250000e-01 : f32
    %23 = vector.broadcast %cst_9 : f32 to vector<1x128xf32>
    %24 = arith.mulf %22, %23 : vector<1x128xf32>
    %cst_10 = arith.constant 9.99999974E-6 : f32
    %25 = vector.broadcast %cst_10 : f32 to vector<1x128xf32>
    %26 = arith.addf %24, %25 : vector<1x128xf32>
    %27 = math.rsqrt %26 : vector<1x128xf32>
    %28 = arith.mulf %3, %27 : vector<1x128xf32>
    %29 = arith.mulf %17, %28 : vector<1x128xf32>
    %30 = arith.subf %4, %29 : vector<1x128xf32>
    %31 = vector.broadcast %28 : vector<1x128xf32> to vector<8x128xf32>
    %32 = arith.mulf %13, %31 : vector<8x128xf32>
    %33 = vector.broadcast %30 : vector<1x128xf32> to vector<8x128xf32>
    %34 = arith.addf %32, %33 : vector<8x128xf32>
    %cst_11 = arith.constant 0.000000e+00 : f32
    %35 = vector.broadcast %cst_11 : f32 to vector<8x128xf32>
    %36 = arith.maximumf %34, %35 : vector<8x128xf32>
    %c1 = arith.constant 1 : index
    %c0_12 = arith.constant 0 : index
    %c0_13 = arith.constant 0 : index
    %37 = vector.load %arg1[%c1, %c0_12, %c0_13] : memref<3x128x128xf32, #tpu.memory_space<vmem>>, vector<1x128x128xf32>
    %38 = vector.shape_cast %37 : vector<1x128x128xf32> to vector<128x128xf32>
    %cst_14 = arith.constant dense<0.000000e+00> : vector<8x128xf32>
    %39 = tpu.matmul %36, %38, %cst_14 {dimension_numbers = #tpu.dot_dimension_numbers<[1], [0], [0], [1], [0, 0, 1, 1], [], []>} : vector<8x128xf32>, vector<128x128xf32>, vector<8x128xf32> -> vector<8x128xf32>
    %40 = vector.broadcast %5 : vector<1x128xf32> to vector<8x128xf32>
    %41 = arith.addf %39, %40 : vector<8x128xf32>
    %cst_15 = arith.constant dense<0.000000e+00> : vector<128xf32>
    %42 = vector.multi_reduction <add>, %41, %cst_15 [0] : vector<8x128xf32> to vector<128xf32>
    %43 = vector.shape_cast %42 : vector<128xf32> to vector<1x128xf32>
    %cst_16 = arith.constant 1.250000e-01 : f32
    %44 = vector.broadcast %cst_16 : f32 to vector<1x128xf32>
    %45 = arith.mulf %43, %44 : vector<1x128xf32>
    %46 = vector.broadcast %45 : vector<1x128xf32> to vector<8x128xf32>
    %47 = arith.subf %41, %46 : vector<8x128xf32>
    %48 = arith.mulf %47, %47 : vector<8x128xf32>
    %cst_17 = arith.constant dense<0.000000e+00> : vector<128xf32>
    %49 = vector.multi_reduction <add>, %48, %cst_17 [0] : vector<8x128xf32> to vector<128xf32>
    %50 = vector.shape_cast %49 : vector<128xf32> to vector<1x128xf32>
    %cst_18 = arith.constant 1.250000e-01 : f32
    %51 = vector.broadcast %cst_18 : f32 to vector<1x128xf32>
    %52 = arith.mulf %50, %51 : vector<1x128xf32>
    %cst_19 = arith.constant 9.99999974E-6 : f32
    %53 = vector.broadcast %cst_19 : f32 to vector<1x128xf32>
    %54 = arith.addf %52, %53 : vector<1x128xf32>
    %55 = math.rsqrt %54 : vector<1x128xf32>
    %56 = arith.mulf %6, %55 : vector<1x128xf32>
    %57 = arith.mulf %45, %56 : vector<1x128xf32>
    %58 = arith.subf %7, %57 : vector<1x128xf32>
    %59 = vector.broadcast %56 : vector<1x128xf32> to vector<8x128xf32>
    %60 = arith.mulf %41, %59 : vector<8x128xf32>
    %61 = vector.broadcast %58 : vector<1x128xf32> to vector<8x128xf32>
    %62 = arith.addf %60, %61 : vector<8x128xf32>
    %cst_20 = arith.constant 0.000000e+00 : f32
    %63 = vector.broadcast %cst_20 : f32 to vector<8x128xf32>
    %64 = arith.maximumf %62, %63 : vector<8x128xf32>
    %c2 = arith.constant 2 : index
    %c0_21 = arith.constant 0 : index
    %c0_22 = arith.constant 0 : index
    %65 = vector.load %arg1[%c2, %c0_21, %c0_22] : memref<3x128x128xf32, #tpu.memory_space<vmem>>, vector<1x128x128xf32>
    %66 = vector.shape_cast %65 : vector<1x128x128xf32> to vector<128x128xf32>
    %cst_23 = arith.constant dense<0.000000e+00> : vector<8x128xf32>
    %67 = tpu.matmul %64, %66, %cst_23 {dimension_numbers = #tpu.dot_dimension_numbers<[1], [0], [0], [1], [0, 0, 1, 1], [], []>} : vector<8x128xf32>, vector<128x128xf32>, vector<8x128xf32> -> vector<8x128xf32>
    %68 = vector.broadcast %8 : vector<1x128xf32> to vector<8x128xf32>
    %69 = arith.addf %67, %68 : vector<8x128xf32>
    %70 = arith.negf %69 : vector<8x128xf32>
    %71 = math.exp %70 : vector<8x128xf32>
    %cst_24 = arith.constant 1.000000e+00 : f32
    %72 = vector.broadcast %cst_24 : f32 to vector<8x128xf32>
    %73 = arith.addf %72, %71 : vector<8x128xf32>
    %74 = arith.divf %72, %73 : vector<8x128xf32>
    %c0_25 = arith.constant 0 : index
    %c0_26 = arith.constant 0 : index
    %c0_27 = arith.constant 0 : index
    %75 = vector.load %arg3[%c0_25, %c0_26, %c0_27] : memref<2x8x128xf32, #tpu.memory_space<vmem>>, vector<1x8x128xf32>
    %76 = vector.shape_cast %75 : vector<1x8x128xf32> to vector<8x128xf32>
    %77 = vector.shape_cast %74 : vector<8x128xf32> to vector<1x8x128xf32>
    tpu.vector_store %arg3[%c0_25, %c0_26, %c0_27], %77 {strides = array<i32>} : memref<2x8x128xf32, #tpu.memory_space<vmem>>, vector<1x8x128xf32>,
    %c1_28 = arith.constant 1 : index
    %c0_29 = arith.constant 0 : index
    %c0_30 = arith.constant 0 : index
    %78 = vector.load %arg3[%c1_28, %c0_29, %c0_30] : memref<2x8x128xf32, #tpu.memory_space<vmem>>, vector<1x8x128xf32>
    %79 = vector.shape_cast %78 : vector<1x8x128xf32> to vector<8x128xf32>
    %80 = vector.shape_cast %64 : vector<8x128xf32> to vector<1x8x128xf32>
    tpu.vector_store %arg3[%c1_28, %c0_29, %c0_30], %80 {strides = array<i32>} : memref<2x8x128xf32, #tpu.memory_space<vmem>>, vector<1x8x128xf32>,
    return
  }
}

</mosaic_0001>

<bundles_post_ra>
// kernel: fcnet_forward.1
= control target key start
LH: loop header
LB: loop body
LE: loop exit
PB: predicated region body
PF: predicated region fallthrough
CT: control target
= control target key end

     0   :  { %8 = vsyncpa [#allocation3], 0  ;;  %s287_s15 = smov [#allocation2]   ;;  %s288_s17 = smov 128   ;;  %s346_s0 = inlined_call_operand.vmem [shape: f32[8,128], index: 0, kind: input, shape index: {}]   ;;  %s347_s1 = inlined_call_operand.hbm [shape: f32[3,128,128], index: 1, kind: input, shape index: {}]   ;;  %s348_s2 = inlined_call_operand.vmem [shape: f32[8,128], index: 2, kind: input, shape index: {}]   ;;  %s349_s3 = inlined_call_operand.vmem [shape: f32[2,8,128], index: 3, kind: output, shape index: {}]  }
   0x1   :  { %s15_s14 = sshll.u32 %s347_s1, 4  ;;  %s17_s16 = sshll.u32 %s287_s15, 4  ;;  %s16_s14 = int_to_ptr.hbm [resolvable:$true] %s15_s14  ;;  %s18_s16 = int_to_ptr.vmem [resolvable:$true] %s17_s16 }
   0x2   :  { %s289_s18 = smov 8  }
   0x3   :  { %23 = dma.hbm_to_vmem [thread:$0]  %s16_s14, 6144, %s18_s16, [#allocation3], %s288_s17, %s288_s17, %s289_s18  }
   0x4   :  { %285 = dma.done.wait [#allocation3], 6144  }
   0x5   :  { %286 = vsyncadd [#allocation3], 4294961152  ;;  %v47_v0 = vld [vmem:[#allocation2 + $0x78] sm:$0xff]  ;;  %v46_v1 = vld [vmem:[#allocation2 + $0x70] sm:$0xff] }
   0x6   :  { %49 = vmatpush.msra.mxu0 %v47_v0  ;;  %v45_v2 = vld [vmem:[#allocation2 + $0x68] sm:$0xff]  ;;  %v44_v3 = vld [vmem:[#allocation2 + $0x60] sm:$0xff]  ;;  %v43_v4 = vld [vmem:[#allocation2 + $0x58] sm:$0xff] }
   0x7   :  { %v42_v5 = vld [vmem:[#allocation2 + $0x50] sm:$0xff]  ;;  %v41_v6 = vld [vmem:[#allocation2 + $0x48] sm:$0xff]  ;;  %v40_v7 = vld [vmem:[#allocation2 + $0x40] sm:$0xff] }
   0x8   :  { %50 = vmatpush.msra.mxu0 %v46_v1  ;;  %v39_v8 = vld [vmem:[#allocation2 + $0x38] sm:$0xff]  ;;  %v38_v9 = vld [vmem:[#allocation2 + $0x30] sm:$0xff]  ;;  %v37_v10 = vld [vmem:[#allocation2 + $0x28] sm:$0xff] }
   0x9   :  { %v36_v11 = vld [vmem:[#allocation2 + $0x20] sm:$0xff]  ;;  %v35_v12 = vld [vmem:[#allocation2 + $0x18] sm:$0xff]  ;;  %v34_v13 = vld [vmem:[#allocation2 + $0x10] sm:$0xff] }
   0xa   :  { %51 = vmatpush.msra.mxu0 %v45_v2  ;;  %v33_v14 = vld [vmem:[#allocation2 + $0x8] sm:$0xff]  ;;  %v32_v15 = vld [vmem:[#allocation2] sm:$0xff]  ;;  %v123_v23 = vld [vmem:[#allocation2 + $0xf8] sm:$0xff] }
   0xb   :  { %v30_v16 = vld [vmem:[%s346_s0] sm:$0xff]  ;;  %v122_v24 = vld [vmem:[#allocation2 + $0xf0] sm:$0xff]  ;;  %125 = vmatpush.msra.mxu1 %v123_v23  ;;  %v121_v26 = vld [vmem:[#allocation2 + $0xe8] sm:$0xff] }
   0xc   :  { %52 = vmatpush.msra.mxu0 %v44_v3  ;;  %v319_v17 = vld [vmem:[%s348_s2] sm:$0xff]  ;;  %v119_v30 = vld [vmem:[#allocation2 + $0xd8] sm:$0xff]  ;;  %v118_v32 = vld [vmem:[#allocation2 + $0xd0] sm:$0xff] }
   0xd   :  { %v48_v18 = vperm.slane %v319_v17, 0  ;;  %126 = vmatpush.msra.mxu1 %v122_v24  ;;  %v120_v28 = vld [vmem:[#allocation2 + $0xe0] sm:$0xff]  ;;  %v117_v34 = vld [vmem:[#allocation2 + $0xc8] sm:$0xff]  ;;  %v115_v38 = vld [vmem:[#allocation2 + $0xb8] sm:$0xff] }
   0xe   :  { %53 = vmatpush.msra.mxu0 %v43_v4  ;;  %v116_v36 = vld [vmem:[#allocation2 + $0xc0] sm:$0xff]  ;;  %v114_v40 = vld [vmem:[#allocation2 + $0xb0] sm:$0xff]  ;;  %v113_v42 = vld [vmem:[#allocation2 + $0xa8] sm:$0xff] }
   0xf   :  { %127 = vmatpush.msra.mxu1 %v121_v26  ;;  %v112_v44 = vld [vmem:[#allocation2 + $0xa0] sm:$0xff]  ;;  %v111_v46 = vld [vmem:[#allocation2 + $0x98] sm:$0xff]  ;;  %v110_v48 = vld [vmem:[#allocation2 + $0x90] sm:$0xff] }
  0x10   :  { %54 = vmatpush.msra.mxu0 %v42_v5  ;;  %v109_v50 = vld [vmem:[#allocation2 + $0x88] sm:$0xff]  ;;  %v108_v52 = vld [vmem:[#allocation2 + $0x80] sm:$0xff] }
  0x11   :  { %128 = vmatpush.msra.mxu1 %v120_v28  ;;  %v193_v23 = vld [vmem:[#allocation2 + $0x148] sm:$0xff] }
  0x12   :  { %55 = vmatpush.msra.mxu0 %v41_v6  ;;  %v124_v6 = vperm.slane %v319_v17, 3 }
  0x13   :  { %129 = vmatpush.msra.mxu1 %v119_v30 }
  0x14   :  { %56 = vmatpush.msra.mxu0 %v40_v7 }
  0x15   :  { %130 = vmatpush.msra.mxu1 %v118_v32 }
  0x16   :  { %57 = vmatpush.msra.mxu0 %v39_v8 }
  0x17   :  { %131 = vmatpush.msra.mxu1 %v117_v34 }
  0x18   :  { %58 = vmatpush.msra.mxu0 %v38_v9 }
  0x19   :  { %132 = vmatpush.msra.mxu1 %v116_v36 }
  0x1a   :  { %59 = vmatpush.msra.mxu0 %v37_v10 }
  0x1b   :  { %133 = vmatpush.msra.mxu1 %v115_v38 }
  0x1c   :  { %60 = vmatpush.msra.mxu0 %v36_v11  ;;  %v199_v11 = vld [vmem:[#allocation2 + $0x178] sm:$0xff] }
  0x1d   :  { %134 = vmatpush.msra.mxu1 %v114_v40  ;;  %201 = vmatpush.msra.mxu2 %v199_v11 }
  0x1e   :  { %61 = vmatpush.msra.mxu0 %v35_v12  ;;  %v198_v12 = vld [vmem:[#allocation2 + $0x170] sm:$0xff] }
  0x1f   :  { %135 = vmatpush.msra.mxu1 %v113_v42  ;;  %202 = vmatpush.msra.mxu2 %v198_v12 }
  0x20   :  { %62 = vmatpush.msra.mxu0 %v34_v13 }
  0x21   :  { %136 = vmatpush.msra.mxu1 %v112_v44 }
  0x22   :  { %63 = vmatpush.msra.mxu0 %v33_v14  ;;  %v197_v14 = vld [vmem:[#allocation2 + $0x168] sm:$0xff] }
  0x23   :  { %137 = vmatpush.msra.mxu1 %v111_v46  ;;  %203 = vmatpush.msra.mxu2 %v197_v14 }
  0x24   :  { %64 = vmatpush.msra.mxu0 %v32_v15 }
  0x25   :  { %65 = vmatmul.f32.vlgmr.msra.gmra.mxu0 %v30_v16  ;;  %138 = vmatpush.msra.mxu1 %v110_v48  ;;  %v196_v16 = vld [vmem:[#allocation2 + $0x160] sm:$0xff] }
  0x26   :  { %204 = vmatpush.msra.mxu2 %v196_v16 }
  0x27   :  { %139 = vmatpush.msra.mxu1 %v109_v50 }
  0x29   :  { %140 = vmatpush.msra.mxu1 %v108_v52 }
  0xa2   :  { %v66_v19 = vpop.f32.mrf.mxu0 }
  0xa3   :  { %v322_v20 = vadd.f32 %v66_v19, %v48_v18  ;;  %v195_v19 = vld [vmem:[#allocation2 + $0x158] sm:$0xff] }
  0xa4   :  { %205 = vmatpush.msra.mxu2 %v195_v19 }
  0xa5   :  { %v69_v21 = vrot.slane %v322_v20, 4 }
  0xa7   :  { %v70_v22 = vadd.f32 %v69_v21, %v322_v20  ;;  %v194_v21 = vld [vmem:[#allocation2 + $0x150] sm:$0xff] }
  0xa8   :  { %206 = vmatpush.msra.mxu2 %v194_v21 }
  0xa9   :  { %v71_v25 = vrot.slane %v70_v22, 2 }
  0xaa   :  { %207 = vmatpush.msra.mxu2 %v193_v23 }
  0xab   :  { %v72_v27 = vadd.f32 %v71_v25, %v70_v22  ;;  %v192_v25 = vld [vmem:[#allocation2 + $0x140] sm:$0xff] }
  0xac   :  { %208 = vmatpush.msra.mxu2 %v192_v25 }
  0xad   :  { %v73_v29 = vrot.slane %v72_v27, 1 }
  0xaf   :  { %v74_v31 = vadd.f32 %v73_v29, %v72_v27  ;;  %v191_v27 = vld [vmem:[#allocation2 + $0x138] sm:$0xff]  ;;  %v190_v29 = vld [vmem:[#allocation2 + $0x130] sm:$0xff] }
  0xb0   :  { %209 = vmatpush.msra.mxu2 %v191_v27 }
  0xb1   :  { %v75_v33 = vmul.f32 0.125, %v74_v31  ;;  %v189_v31 = vld [vmem:[#allocation2 + $0x128] sm:$0xff] }
  0xb2   :  { %210 = vmatpush.msra.mxu2 %v190_v29 }
  0xb3   :  { %v76_v35 = vsub.f32 %v322_v20, %v75_v33 }
  0xb4   :  { %211 = vmatpush.msra.mxu2 %v189_v31 }
  0xb5   :  { %v77_v37 = vmul.f32 %v76_v35, %v76_v35  ;;  %v187_v35 = vld [vmem:[#allocation2 + $0x118] sm:$0xff] }
  0xb7   :  { %v78_v39 = vrot.slane %v77_v37, 4 }
  0xb9   :  { %v79_v41 = vadd.f32 %v78_v39, %v77_v37  ;;  %v186_v37 = vld [vmem:[#allocation2 + $0x110] sm:$0xff]  ;;  %v185_v39 = vld [vmem:[#allocation2 + $0x108] sm:$0xff] }
  0xbb   :  { %v80_v43 = vrot.slane %v79_v41, 2 }
  0xbd   :  { %v81_v45 = vadd.f32 %v80_v43, %v79_v41  ;;  %v184_v41 = vld [vmem:[#allocation2 + $0x100] sm:$0xff] }
  0xbf   :  { %v82_v47 = vrot.slane %v81_v45, 1 }
  0xc1   :  { %v83_v49 = vadd.f32 %v82_v47, %v81_v45 }
  0xc3   :  { %v84_v51 = vmul.f32 0.125, %v83_v49 }
  0xc5   :  { %v85_v53 = vadd.f32 1e-05, %v84_v51 }
  0xc7   :  { %253 = vrsqrt.f32 %v85_v53  ;;  %vm92_vm1 = vweird.f32 %v85_v53 }
  0xcd   :  { %v254_v54 = vpop.eup %253 }
  0xce   :  { %v87_v55 = vmul.f32 %v254_v54, %v85_v53  ;;  %vm93_vm0 = vweird.f32 %v254_v54 }
  0xcf   :  { %vm94_vm2 = vmor %vm92_vm1, %vm93_vm0 }
  0xd0   :  { %v88_v56 = vmul.f32 %v254_v54, %v87_v55 }
  0xd2   :  { %v89_v57 = vmul.f32 0.5, %v88_v56 }
  0xd4   :  { %v90_v58 = vsub.f32 1.5, %v89_v57 }
  0xd6   :  { %v91_v59 = vmul.f32 %v254_v54, %v90_v58 }
  0xd8   :  { %v95_v60 = vsel %vm94_vm2, %v254_v54, %v91_v59  ;;  %v200_v59 = vperm.slane %v319_v17, 6 }
  0xd9   :  { %v96_v61 = vmul.f32 %v95_v60, %v319_v17 }
  0xdb   :  { %v97_v62 = vmul.f32 %v96_v61, %v75_v33  ;;  %v102_v0 = vperm.slane %v96_v61, 1  ;;  %v188_v33 = vld [vmem:[#allocation2 + $0x120] sm:$0xff] }
  0xdc   :  { %212 = vmatpush.msra.mxu2 %v188_v33 }
  0xdd   :  { %v99_v63 = vrot.slane %v97_v62, 7  ;;  %v103_v2 = vmul.f32 %v102_v0, %v322_v20 }
  0xde   :  { %213 = vmatpush.msra.mxu2 %v187_v35 }
  0xdf   :  { %v101_v1 = vsub.f32 %v319_v17, %v99_v63 }
  0xe0   :  { %214 = vmatpush.msra.mxu2 %v186_v37 }
  0xe1   :  { %v104_v3 = vperm.slane %v101_v1, 2 }
  0xe2   :  { %215 = vmatpush.msra.mxu2 %v185_v39 }
  0xe3   :  { %v105_v4 = vadd.f32 %v104_v3, %v103_v2 }
  0xe4   :  { %216 = vmatpush.msra.mxu2 %v184_v41 }
  0xe5   :  { %v106_v5 = vmax.f32 %v105_v4, 0.0 }
  0xe7   :  { %141 = vmatmul.f32.vlgmr.msra.gmra.mxu1 %v106_v5 }
 0x164   :  { %v142_v7 = vpop.f32.mrf.mxu1 }
 0x165   :  { %v331_v8 = vadd.f32 %v142_v7, %v124_v6 }
 0x167   :  { %v145_v9 = vrot.slane %v331_v8, 4 }
 0x169   :  { %v146_v10 = vadd.f32 %v145_v9, %v331_v8 }
 0x16b   :  { %v147_v13 = vrot.slane %v146_v10, 2 }
 0x16d   :  { %v148_v15 = vadd.f32 %v147_v13, %v146_v10 }
 0x16f   :  { %v149_v18 = vrot.slane %v148_v15, 1 }
 0x171   :  { %v150_v20 = vadd.f32 %v149_v18, %v148_v15 }
 0x173   :  { %v151_v22 = vmul.f32 0.125, %v150_v20 }
 0x175   :  { %v152_v24 = vsub.f32 %v331_v8, %v151_v22 }
 0x177   :  { %v153_v26 = vmul.f32 %v152_v24, %v152_v24 }
 0x179   :  { %v154_v28 = vrot.slane %v153_v26, 4 }
 0x17b   :  { %v155_v30 = vadd.f32 %v154_v28, %v153_v26 }
 0x17d   :  { %v156_v32 = vrot.slane %v155_v30, 2 }
 0x17f   :  { %v157_v34 = vadd.f32 %v156_v32, %v155_v30 }
 0x181   :  { %v158_v36 = vrot.slane %v157_v34, 1 }
 0x183   :  { %v159_v38 = vadd.f32 %v158_v36, %v157_v34 }
 0x185   :  { %v160_v40 = vmul.f32 0.125, %v159_v38 }
 0x187   :  { %v161_v42 = vadd.f32 1e-05, %v160_v40 }
 0x189   :  { %255 = vrsqrt.f32 %v161_v42  ;;  %vm168_vm4 = vweird.f32 %v161_v42 }
 0x18f   :  { %v256_v43 = vpop.eup %255 }
 0x190   :  { %v163_v44 = vmul.f32 %v256_v43, %v161_v42  ;;  %vm169_vm3 = vweird.f32 %v256_v43 }
 0x191   :  { %vm170_vm5 = vmor %vm168_vm4, %vm169_vm3 }
 0x192   :  { %v164_v45 = vmul.f32 %v256_v43, %v163_v44 }
 0x194   :  { %v165_v46 = vmul.f32 0.5, %v164_v45 }
 0x196   :  { %v166_v47 = vsub.f32 1.5, %v165_v46 }
 0x198   :  { %v167_v48 = vmul.f32 %v256_v43, %v166_v47 }
 0x19a   :  { %v171_v49 = vsel %vm170_vm5, %v256_v43, %v167_v48 }
 0x19b   :  { %v172_v50 = vmul.f32 %v171_v49, %v319_v17 }
 0x19d   :  { %v173_v51 = vmul.f32 %v172_v50, %v151_v22  ;;  %v178_v53 = vperm.slane %v172_v50, 4 }
 0x19f   :  { %v175_v52 = vrot.slane %v173_v51, 7  ;;  %v179_v55 = vmul.f32 %v178_v53, %v331_v8 }
 0x1a1   :  { %v177_v54 = vsub.f32 %v319_v17, %v175_v52 }
 0x1a3   :  { %v180_v56 = vperm.slane %v177_v54, 5 }
 0x1a5   :  { %v181_v57 = vadd.f32 %v180_v56, %v179_v55 }
 0x1a7   :  { %v182_v58 = vmax.f32 %v181_v57, 0.0 }
 0x1a9   :  { %217 = vmatmul.f32.vlgmr.msra.gmra.mxu2 %v182_v58  ;;  %249 = vst [vmem:[%s349_s3 + $0x8] sm:$0xff] %v182_v58 }
 0x22c   :  { %v218_v60 = vpop.f32.mrf.mxu2 }
 0x22d   :  { %v219_v61 = vadd.f32 %v218_v60, %v200_v59 }
 0x22f   :  { %v248_v62 = vmul.f32 -1.442695, %v219_v61 }
 0x231   :  { %257 = vpow2.f32 %v248_v62 }
 0x237   :  { %v258_v63 = vpop.eup %257 }
 0x238   :  { %v224_v0 = vadd.f32 1.0, %v258_v63 }
 0x23a   :  { %259 = vrcp.f32 %v224_v0  ;;  %v236_v4 = vand.u32 2147483648, %v224_v0  ;;  %v234_v6 = vand.u32 2147483647, %v224_v0  ;;  %vm230_vm7 = vweird.f32 %v224_v0 }
 0x23c   :  { %v237_v8 = vor.u32 1.1754944e-38, %v236_v4  ;;  %vm235_vm9 = vcmp.eq.f32.partialorder %v234_v6, 8.507059e+37 }
 0x240   :  { %v260_v1 = vpop.eup %259 }
 0x241   :  { %v226_v2 = vmul.f32 %v260_v1, %v224_v0  ;;  %vm231_vm6 = vweird.f32 %v260_v1 }
 0x242   :  { %vm232_vm8 = vmor %vm230_vm7, %vm231_vm6 }
 0x243   :  { %v227_v3 = vsub.f32 1.0, %v226_v2 }
 0x245   :  { %v228_v5 = vmul.f32 %v260_v1, %v227_v3 }
 0x247   :  { %v229_v7 = vadd.f32 %v260_v1, %v228_v5 }
 0x249   :  { %v233_v9 = vsel %vm232_vm8, %v260_v1, %v229_v7 }
 0x24a   :  { %v238_v17 = vsel %vm235_vm9, %v237_v8, %v233_v9 }
 0x24b   :  { %240 = vst [vmem:[%s349_s3] sm:$0xff] %v238_v17 }
 0x24c   :  { %247 = vsyncpa [#allocation3], 1 }

</bundles_post_ra>
